<compile_context>
chip_gen: v6e
topology: v6e:2x2x1
jax: 0.10.0
libtpu: 0.0.40
codegen_flags: <defaults>
</compile_context>

<pallas_src>
import math

import jax
import jax.numpy as jnp
from jax.experimental import pallas as pl
from jax.experimental.pallas import tpu as pltpu


# --------------------------------------------------------------------------------------
# Fused kernel: time encoding -> Linear -> SiLU -> Linear (activations stay in VMEM)
# --------------------------------------------------------------------------------------
def _timestep_embedder_kernel(t_ref, freq_ref, w1_ref, b1_ref, w2_ref, b2_ref, o_ref):
    H = freq_ref.shape[-1]
    half = H // 2

    t = t_ref[...]                                    # (TB, 1)
    arg = t * freq_ref[...]                           # (TB, H); freq = [inv_freq, inv_freq]
    lane = jax.lax.broadcasted_iota(jnp.int32, arg.shape, 1)
    enc = jnp.where(lane < half, jnp.sin(arg), jnp.cos(arg))   # == cat([sin, cos], -1)
    x = t + enc                                       # torch: t + time_encoding(t, H)

    # TODO(synk): at production H, cast x/h and w1/w2 to bf16 before jnp.dot (full-rate
    # MXU on v6e/v7x, half the weight HBM/VMEM traffic); kept f32 here for parity.
    h = jnp.dot(x, w1_ref[...], preferred_element_type=jnp.float32) + b1_ref[...]
    # Exact SiLU via tanh: x * sigmoid(x) == x * 0.5 * (1 + tanh(x/2)) -> single EUP push.
    h = h * (0.5 * (1.0 + jnp.tanh(0.5 * h)))
    o_ref[...] = jnp.dot(h, w2_ref[...], preferred_element_type=jnp.float32) + b2_ref[...]


@jax.jit
def timestep_embedder_forward(params, t):
    """t: (B, 1) float32 scalar timesteps; returns (B, H) embedding."""
    w1, b1, w2, b2 = params["w1"], params["b1"], params["w2"], params["b2"]
    freq = params["freq"]
    H = w1.shape[0]
    B = t.shape[0]

    # Row tile: multiple of 8 (full f32 sublanes / unmasked stores), capped at 256.
    TB = min(256, pl.cdiv(B, 8) * 8)
    Bp = pl.cdiv(B, TB) * TB
    t_pad = jnp.pad(t, ((0, Bp - B), (0, 0))) if Bp != B else t

    out = pl.pallas_call(
        _timestep_embedder_kernel,
        grid=(Bp // TB,),
        in_specs=[
            pl.BlockSpec((TB, 1), lambda i: (i, 0)),   # timesteps, row-tiled
            pl.BlockSpec((1, H), lambda i: (0, 0)),    # frequency table (resident)
            pl.BlockSpec((H, H), lambda i: (0, 0)),    # w1              (resident)
            pl.BlockSpec((1, H), lambda i: (0, 0)),    # b1              (resident)
            pl.BlockSpec((H, H), lambda i: (0, 0)),    # w2              (resident)
            pl.BlockSpec((1, H), lambda i: (0, 0)),    # b2              (resident)
        ],
        out_specs=pl.BlockSpec((TB, H), lambda i: (i, 0)),
        out_shape=jax.ShapeDtypeStruct((Bp, H), jnp.float32),
        compiler_params=pltpu.CompilerParams(dimension_semantics=("parallel",)),
    )(t_pad, freq, w1, b1, w2, b2)
    return out[:B]


# --------------------------------------------------------------------------------------
# Parameters (weights (in, out); biases (1, out); freq table precomputed once)
# --------------------------------------------------------------------------------------
def init_params(key, hidden_size):
    k1, k2, k3, k4 = jax.random.split(key, 4)
    std = math.sqrt(2.0 / (2 * hidden_size))
    inv_freq = 1.0 / (10000.0 ** (jnp.arange(0, hidden_size, 2, dtype=jnp.float32)
                                  / hidden_size))
    freq = jnp.concatenate([inv_freq, inv_freq])[None, :]        # (1, H): j -> inv_freq[j % H/2]
    return {
        "w1": std * jax.random.normal(k1, (hidden_size, hidden_size), jnp.float32),
        "b1": 0.02 * jax.random.normal(k2, (1, hidden_size), jnp.float32),
        "w2": std * jax.random.normal(k3, (hidden_size, hidden_size), jnp.float32),
        "b2": 0.02 * jax.random.normal(k4, (1, hidden_size), jnp.float32),
        "freq": freq,
    }


def reference_forward(params, t):
    """Pure-JAX mirror of the torch module (time_encoding + Linear/SiLU/Linear)."""
    H = params["w1"].shape[0]
    inv_freq = 1.0 / (10000.0 ** (jnp.arange(0, H, 2, dtype=jnp.float32) / H))
    arg = t * inv_freq[None, :]
    enc = jnp.concatenate([jnp.sin(arg), jnp.cos(arg)], axis=-1)
    x = t + enc
    h = x @ params["w1"] + params["b1"]
    h = h * jax.nn.sigmoid(h)
    return h @ params["w2"] + params["b2"]


# --------------------------------------------------------------------------------------
if __name__ == "__main__":
    B, hidden_size = 2, 128          # H = 128 -> lane-dense output, (8,128)-aligned tiles

    key = jax.random.PRNGKey(0)
    kt, kp = jax.random.split(key)
    t = jax.random.uniform(kt, (B, 1), jnp.float32, 0.0, 1.0)   # normalized timesteps
    params = init_params(kp, hidden_size)

    out = jax.block_until_ready(timestep_embedder_forward(params, t))
    ref = jax.block_until_ready(reference_forward(params, t))

    err = float(jnp.max(jnp.abs(out - ref)))
    ok = (out.shape == (B, hidden_size)
          and bool(jnp.all(jnp.isfinite(out)))
          and err < 1e-3)
    if not ok:
        raise SystemExit(f"kernel mismatch: max_abs_err={err}")
    print("KERNEL_OK")
</pallas_src>

<mosaic_0001>
module attributes {stable_mosaic.version = 11 : i64} {
  func.func @_timestep_embedder_kernel(%arg0: i32, %arg1: memref<8x1xf32, #tpu.memory_space<vmem>>, %arg2: memref<1x128xf32, #tpu.memory_space<vmem>>, %arg3: memref<128x128xf32, #tpu.memory_space<vmem>>, %arg4: memref<1x128xf32, #tpu.memory_space<vmem>>, %arg5: memref<128x128xf32, #tpu.memory_space<vmem>>, %arg6: memref<1x128xf32, #tpu.memory_space<vmem>>, %arg7: memref<8x128xf32, #tpu.memory_space<vmem>>) attributes {dimension_semantics = [#tpu.dimension_semantics<parallel>], iteration_bounds = array<i64: 1>, scalar_prefetch = 0 : i64, scratch_operands = 0 : i64, tpu.core_type = #tpu.core_type<tc>, window_params = [{transform_indices = @transform_0, window_bounds = array<i64: 8, 1>}, {pipeline_mode = #tpu.pipeline_mode<synchronous>, transform_indices = @transform_1, window_bounds = array<i64: 1, 128>}, {pipeline_mode = #tpu.pipeline_mode<synchronous>, transform_indices = @transform_2, window_bounds = array<i64: 128, 128>}, {pipeline_mode = #tpu.pipeline_mode<synchronous>, transform_indices = @transform_3, window_bounds = array<i64: 1, 128>}, {pipeline_mode = #tpu.pipeline_mode<synchronous>, transform_indices = @transform_4, window_bounds = array<i64: 128, 128>}, {pipeline_mode = #tpu.pipeline_mode<synchronous>, transform_indices = @transform_5, window_bounds = array<i64: 1, 128>}, {transform_indices = @transform_6, window_bounds = array<i64: 8, 128>}]} {
    %c0 = arith.constant 0 : index
    %c0_0 = arith.constant 0 : index
    %0 = vector.load %arg1[%c0, %c0_0] : memref<8x1xf32, #tpu.memory_space<vmem>>, vector<8x1xf32>
    %c0_1 = arith.constant 0 : index
    %c0_2 = arith.constant 0 : index
    %1 = vector.load %arg2[%c0_1, %c0_2] : memref<1x128xf32, #tpu.memory_space<vmem>>, vector<1x128xf32>
    %2 = vector.broadcast %0 : vector<8x1xf32> to vector<8x128xf32>
    %3 = vector.broadcast %1 : vector<1x128xf32> to vector<8x128xf32>
    %4 = arith.mulf %2, %3 : vector<8x128xf32>
    %5 = tpu.iota {dimensions = array<i32: 1>} : vector<8x128xi32>
    %c64_i32 = arith.constant 64 : i32
    %6 = vector.broadcast %c64_i32 : i32 to vector<8x128xi32>
    %7 = arith.cmpi slt, %5, %6 : vector<8x128xi32>
    %8 = math.sin %4 : vector<8x128xf32>
    %9 = math.cos %4 : vector<8x128xf32>
    %10 = arith.select %7, %8, %9 : vector<8x128xi1>, vector<8x128xf32>
    %11 = vector.broadcast %0 : vector<8x1xf32> to vector<8x128xf32>
    %12 = arith.addf %11, %10 : vector<8x128xf32>
    %c0_3 = arith.constant 0 : index
    %c0_4 = arith.constant 0 : index
    %13 = vector.load %arg3[%c0_3, %c0_4] : memref<128x128xf32, #tpu.memory_space<vmem>>, vector<128x128xf32>
    %cst = arith.constant dense<0.000000e+00> : vector<8x128xf32>
    %14 = tpu.matmul %12, %13, %cst {dimension_numbers = #tpu.dot_dimension_numbers<[1], [0], [0], [1], [0, 0, 1, 1], [], []>} : vector<8x128xf32>, vector<128x128xf32>, vector<8x128xf32> -> vector<8x128xf32>
    %c0_5 = arith.constant 0 : index
    %c0_6 = arith.constant 0 : index
    %15 = vector.load %arg4[%c0_5, %c0_6] : memref<1x128xf32, #tpu.memory_space<vmem>>, vector<1x128xf32>
    %16 = vector.broadcast %15 : vector<1x128xf32> to vector<8x128xf32>
    %17 = arith.addf %14, %16 : vector<8x128xf32>
    %cst_7 = arith.constant 5.000000e-01 : f32
    %18 = vector.broadcast %cst_7 : f32 to vector<8x128xf32>
    %19 = arith.mulf %18, %17 : vector<8x128xf32>
    %20 = math.tanh %19 : vector<8x128xf32>
    %cst_8 = arith.constant 1.000000e+00 : f32
    %21 = vector.broadcast %cst_8 : f32 to vector<8x128xf32>
    %22 = arith.addf %21, %20 : vector<8x128xf32>
    %cst_9 = arith.constant 5.000000e-01 : f32
    %23 = vector.broadcast %cst_9 : f32 to vector<8x128xf32>
    %24 = arith.mulf %23, %22 : vector<8x128xf32>
    %25 = arith.mulf %17, %24 : vector<8x128xf32>
    %c0_10 = arith.constant 0 : index
    %c0_11 = arith.constant 0 : index
    %26 = vector.load %arg5[%c0_10, %c0_11] : memref<128x128xf32, #tpu.memory_space<vmem>>, vector<128x128xf32>
    %cst_12 = arith.constant dense<0.000000e+00> : vector<8x128xf32>
    %27 = tpu.matmul %25, %26, %cst_12 {dimension_numbers = #tpu.dot_dimension_numbers<[1], [0], [0], [1], [0, 0, 1, 1], [], []>} : vector<8x128xf32>, vector<128x128xf32>, vector<8x128xf32> -> vector<8x128xf32>
    %c0_13 = arith.constant 0 : index
    %c0_14 = arith.constant 0 : index
    %28 = vector.load %arg6[%c0_13, %c0_14] : memref<1x128xf32, #tpu.memory_space<vmem>>, vector<1x128xf32>
    %29 = vector.broadcast %28 : vector<1x128xf32> to vector<8x128xf32>
    %30 = arith.addf %27, %29 : vector<8x128xf32>
    %c0_15 = arith.constant 0 : index
    %c0_16 = arith.constant 0 : index
    %31 = vector.load %arg7[%c0_15, %c0_16] : memref<8x128xf32, #tpu.memory_space<vmem>>, vector<8x128xf32>
    tpu.vector_store %arg7[%c0_15, %c0_16], %30 {strides = array<i32>} : memref<8x128xf32, #tpu.memory_space<vmem>>, vector<8x128xf32>,
    return
  }
  func.func @transform_0(%arg0: i32) -> (i32, i32) {
    %c0_i32 = arith.constant 0 : i32
    %c0_i32_0 = arith.constant 0 : i32
    return %arg0, %c0_i32 : i32, i32
  }
  func.func @transform_1(%arg0: i32) -> (i32, i32) {
    %c0_i32 = arith.constant 0 : i32
    %c0_i32_0 = arith.constant 0 : i32
    %c0_i32_1 = arith.constant 0 : i32
    return %c0_i32, %c0_i32_0 : i32, i32
  }
  func.func @transform_2(%arg0: i32) -> (i32, i32) {
    %c0_i32 = arith.constant 0 : i32
    %c0_i32_0 = arith.constant 0 : i32
    %c0_i32_1 = arith.constant 0 : i32
    return %c0_i32, %c0_i32_0 : i32, i32
  }
  func.func @transform_3(%arg0: i32) -> (i32, i32) {
    %c0_i32 = arith.constant 0 : i32
    %c0_i32_0 = arith.constant 0 : i32
    %c0_i32_1 = arith.constant 0 : i32
    return %c0_i32, %c0_i32_0 : i32, i32
  }
  func.func @transform_4(%arg0: i32) -> (i32, i32) {
    %c0_i32 = arith.constant 0 : i32
    %c0_i32_0 = arith.constant 0 : i32
    %c0_i32_1 = arith.constant 0 : i32
    return %c0_i32, %c0_i32_0 : i32, i32
  }
  func.func @transform_5(%arg0: i32) -> (i32, i32) {
    %c0_i32 = arith.constant 0 : i32
    %c0_i32_0 = arith.constant 0 : i32
    %c0_i32_1 = arith.constant 0 : i32
    return %c0_i32, %c0_i32_0 : i32, i32
  }
  func.func @transform_6(%arg0: i32) -> (i32, i32) {
    %c0_i32 = arith.constant 0 : i32
    %c0_i32_0 = arith.constant 0 : i32
    return %arg0, %c0_i32 : i32, i32
  }
}

</mosaic_0001>

<bundles_post_ra>
// kernel: timestep_embedder_forward.1
= control target key start
LH: loop header
LB: loop body
LE: loop exit
PB: predicated region body
PF: predicated region fallthrough
CT: control target
= control target key end

     0   :  { %11 = vsyncpa [#allocation3], 0  ;;  %s787_s0 = inlined_call_operand.vmem [shape: f32[8,1], index: 0, kind: input, shape index: {}]   ;;  %s788_s1 = inlined_call_operand.vmem [shape: f32[1,128], index: 1, kind: input, shape index: {}]   ;;  %s789_s2 = inlined_call_operand.hbm [shape: f32[128,128], index: 2, kind: input, shape index: {}]   ;;  %s790_s3 = inlined_call_operand.vmem [shape: f32[1,128], index: 3, kind: input, shape index: {}]   ;;  %s791_s4 = inlined_call_operand.hbm [shape: f32[128,128], index: 4, kind: input, shape index: {}]   ;;  %s792_s5 = inlined_call_operand.vmem [shape: f32[1,128], index: 5, kind: input, shape index: {}]   ;;  %s793_s6 = inlined_call_operand.vmem [shape: f32[8,128], index: 6, kind: output, shape index: {}]  }
   0x1   :  { %12 = vsyncpa [#allocation5], 0  ;;  %s658_s21 = smov [#allocation2]  }
   0x2   :  { %s22_s22 = sshll.u32 %s658_s21, 4  ;;  %s23_s22 = int_to_ptr.vmem [resolvable:$true] %s22_s22 }
   0x3   :  { %s622_s23 = scalar_lea.vmem %s23_s22, 2048  ;;  %p627_p1 = scmp.lt.s32.totalorder %s23_s22, %s23_s22 }
   0x4   :  { %p623_p0 = scmp.ne.s32.totalorder %s23_s22, %s622_s23  ;;  %p628_p2 = scmp.lt.s32.totalorder %s622_s23, %s622_s23 }
   0x6   :  { %p629_p3 = por %p628_p2, %p627_p1 }
   0x8   :  { %p630_p4 = pnand %p629_p3, %p623_p0 }
   0xa   :  { %633 = shalt.err (!%p630_p4)
}
   0xb   :  { %s659_s24 = smov 128   ;;  %s660_s25 = smov 8  }
   0xc   :  { %28 = dma.hbm_to_vmem [thread:$0]  %s789_s2, 2048, %s23_s22, [#allocation3], %s659_s24, %s659_s24, %s660_s25  }
   0xd   :  { %s661_s28 = smov [#allocation4]  }
   0xe   :  { %s36_s29 = sshll.u32 %s661_s28, 4  ;;  %s37_s29 = int_to_ptr.vmem [resolvable:$true] %s36_s29 }
   0xf   :  { %s642_s30 = scalar_lea.vmem %s37_s29, 2048  ;;  %p647_p6 = scmp.lt.s32.totalorder %s37_s29, %s37_s29 }
  0x10   :  { %p643_p5 = scmp.ne.s32.totalorder %s37_s29, %s642_s30  ;;  %p648_p7 = scmp.lt.s32.totalorder %s642_s30, %s642_s30 }
  0x12   :  { %p649_p8 = por %p648_p7, %p647_p6 }
  0x14   :  { %p650_p9 = pnand %p649_p8, %p643_p5 }
  0x16   :  { %653 = shalt.err (!%p650_p9)
}
  0x17   :  { %42 = dma.hbm_to_vmem [thread:$0]  %s791_s4, 2048, %s37_s29, [#allocation5], %s659_s24, %s659_s24, %s660_s25  }
  0x18   :  { %654 = dma.done.wait [#allocation3], 2048  }
  0x19   :  { %655 = vsyncadd [#allocation3], 4294965248 }
  0x1a   :  { %656 = dma.done.wait [#allocation5], 2048  }
  0x1b   :  { %657 = vsyncadd [#allocation5], 4294965248  ;;  %v662_v0 = vmov 0   ;;  %v51_v1 = vld [vmem:[%s787_s0] sm:$0xff]  ;;  %v663_v2 = vmov 0.0   ;;  %v292_v3 = vld [vmem:[#allocation2 + $0x78] sm:$0xff] }
  0x1c   :  { %607 = vset.pattern.permute.xlu0 %v662_v0  ;;  %520 = vmatprep.subr.mxu0 %v663_v2  ;;  %v291_v4 = vld [vmem:[#allocation2 + $0x70] sm:$0xff]  ;;  %v290_v5 = vld [vmem:[#allocation2 + $0x68] sm:$0xff]  ;;  %v289_v6 = vld [vmem:[#allocation2 + $0x60] sm:$0xff]  ;;  %vm664_vm0 = vmmov 0   ;;  %v665_v35 = vmov 683565275  }
  0x1d   :  { %55 = vperm.xlu0 %607, %v51_v1   ;;  %555 = vmatprep.subr.mxu1 %v663_v2  ;;  %v288_v7 = vld [vmem:[#allocation2 + $0x58] sm:$0xff]  ;;  %v287_v8 = vld [vmem:[#allocation2 + $0x50] sm:$0xff]  ;;  %v286_v9 = vld [vmem:[#allocation2 + $0x48] sm:$0xff]  ;;  %v666_v37 = vmov 2475754826  }
  0x1e   :  { %521 = vmatpush3.msra.mxu0 %v292_v3  ;;  %v285_v10 = vld [vmem:[#allocation2 + $0x40] sm:$0xff]  ;;  %v284_v11 = vld [vmem:[#allocation2 + $0x38] sm:$0xff]  ;;  %v283_v12 = vld [vmem:[#allocation2 + $0x30] sm:$0xff]  ;;  %552 = vmatprep.mubr.msk.f32.mxu0 %vm664_vm0, %v663_v2  ;;  %v667_v40 = vmov 2131351028  }
  0x1f   :  { %522 = vmatprep.subr.mxu0 %v663_v2  ;;  %v282_v13 = vld [vmem:[#allocation2 + $0x28] sm:$0xff]  ;;  %v281_v14 = vld [vmem:[#allocation2 + $0x20] sm:$0xff]  ;;  %v280_v15 = vld [vmem:[#allocation2 + $0x18] sm:$0xff]  ;;  %587 = vmatprep.mubr.msk.f32.mxu1 %vm664_vm0, %v663_v2  ;;  %v668_v43 = vmov 2102212464  }
  0x20   :  { %523 = vmatpush3.msra.mxu0 %v291_v4  ;;  %v279_v16 = vld [vmem:[#allocation2 + $0x10] sm:$0xff]  ;;  %v278_v17 = vld [vmem:[#allocation2 + $0x8] sm:$0xff]  ;;  %v277_v18 = vld [vmem:[#allocation2] sm:$0xff]  ;;  %v669_v46 = vmov 920167782  }
  0x21   :  { %524 = vmatprep.subr.mxu0 %v663_v2  ;;  %v390_v19 = vld [vmem:[#allocation4 + $0x78] sm:$0xff]  ;;  %v389_v20 = vld [vmem:[#allocation4 + $0x70] sm:$0xff]  ;;  %v388_v21 = vld [vmem:[#allocation4 + $0x68] sm:$0xff]  ;;  %v670_v49 = vmov 1326507024  }
  0x22   :  { %525 = vmatpush3.msra.mxu0 %v290_v5  ;;  %556 = vmatpush3.msra.mxu1 %v390_v19  ;;  %v475_v22 = vld [vmem:[%s788_s1] ss:$0 sm:$0xff] }
  0x23   :  { %526 = vmatprep.subr.mxu0 %v663_v2  ;;  %557 = vmatprep.subr.mxu1 %v663_v2 }
  0x24   :  { %527 = vmatpush3.msra.mxu0 %v289_v6  ;;  %558 = vmatpush3.msra.mxu1 %v389_v20 }
  0x25   :  { %528 = vmatprep.subr.mxu0 %v663_v2  ;;  %559 = vmatprep.subr.mxu1 %v663_v2 }
  0x26   :  { %529 = vmatpush3.msra.mxu0 %v288_v7  ;;  %560 = vmatpush3.msra.mxu1 %v388_v21 }
  0x27   :  { %530 = vmatprep.subr.mxu0 %v663_v2  ;;  %561 = vmatprep.subr.mxu1 %v663_v2 }
  0x28   :  { %531 = vmatpush3.msra.mxu0 %v287_v8 }
  0x29   :  { %532 = vmatprep.subr.mxu0 %v663_v2 }
  0x2a   :  { %533 = vmatpush3.msra.mxu0 %v286_v9 }
  0x2b   :  { %534 = vmatprep.subr.mxu0 %v663_v2 }
  0x2c   :  { %535 = vmatpush3.msra.mxu0 %v285_v10 }
  0x2d   :  { %536 = vmatprep.subr.mxu0 %v663_v2 }
  0x2e   :  { %537 = vmatpush3.msra.mxu0 %v284_v11 }
  0x2f   :  { %538 = vmatprep.subr.mxu0 %v663_v2 }
  0x30   :  { %539 = vmatpush3.msra.mxu0 %v283_v12 }
  0x31   :  { %540 = vmatprep.subr.mxu0 %v663_v2 }
  0x32   :  { %541 = vmatpush3.msra.mxu0 %v282_v13 }
  0x33   :  { %542 = vmatprep.subr.mxu0 %v663_v2 }
  0x34   :  { %543 = vmatpush3.msra.mxu0 %v281_v14 }
  0x35   :  { %544 = vmatprep.subr.mxu0 %v663_v2 }
  0x36   :  { %545 = vmatpush3.msra.mxu0 %v280_v15 }
  0x37   :  { %546 = vmatprep.subr.mxu0 %v663_v2 }
  0x38   :  { %547 = vmatpush3.msra.mxu0 %v279_v16 }
  0x39   :  { %548 = vmatprep.subr.mxu0 %v663_v2 }
  0x3a   :  { %549 = vmatpush3.msra.mxu0 %v278_v17 }
  0x3b   :  { %550 = vmatprep.subr.mxu0 %v663_v2 }
  0x3c   :  { %551 = vmatpush3.msra.mxu0 %v277_v18 }
  0x98   :  { %v740_v23 = vpop.permute.xlu0 %55 }
  0x99   :  { %v743_v24 = vmul.f32 %v475_v22, %v740_v23 }
  0x9b   :  { %v71_v25 = vand.u32 2139095040, %v743_v24  ;;  %v68_v29 = vand.u32 2147483647, %v743_v24  ;;  %vm70_vm8 = vcmp.lt.s32.totalorder %v743_v24, 0 }
  0x9d   :  { %v72_v26 = vshrl.u32 %v71_v25, 23  ;;  %v75_v32 = vand.u32 8388607, %v68_v29  ;;  %vm69_vm9 = vcmp.le.f32.partialorder %v68_v29, 0.7853982 }
  0x9f   :  { %v476_v27 = vadd.s32 4294967169, %v72_v26  ;;  %v76_v51 = vor.u32 8388608, %v75_v32 }
  0xa1   :  { %v78_v28 = vadd.s32 1, %v476_v27  ;;  %v116_v1 = vshll.u32 %v76_v51, 8 }
  0xa3   :  { %vm79_vm1 = vcmp.gt.s32.totalorder %v78_v28, 0 }
  0xa4   :  { %v80_v30 = vsel %vm79_vm1, %v78_v28, 0  ;;  %vm160_vm1 = vweird.f32 %v743_v24 }
  0xa5   :  { %v82_v31 = vand.u32 31, %v80_v30  ;;  %v81_v34 = vshrl.u32 %v80_v30, 5 }
  0xa7   :  { %v83_v33 = vsub.s32 32, %v82_v31  ;;  %v85_v36 = vshll.u32 %v665_v35, %v82_v31  ;;  %v88_v38 = vshll.u32 %v666_v37, %v82_v31  ;;  %v91_v42 = vshll.u32 %v667_v40, %v82_v31 }
  0xa8   :  { %v94_v45 = vshll.u32 %v668_v43, %v82_v31  ;;  %v97_v48 = vshll.u32 %v669_v46, %v82_v31  ;;  %vm100_vm2 = vcmp.lt.s32.totalorder %v81_v34, 1  ;;  %vm103_vm3 = vcmp.lt.s32.totalorder %v81_v34, 4 }
  0xa9   :  { %v86_v39 = vshrl.u32 %v666_v37, %v83_v33  ;;  %v89_v41 = vshrl.u32 %v667_v40, %v83_v33  ;;  %v92_v44 = vshrl.u32 %v668_v43, %v83_v33  ;;  %v95_v47 = vshrl.u32 %v669_v46, %v83_v33 }
  0xaa   :  { %v98_v50 = vshrl.u32 %v670_v49, %v83_v33  ;;  %v84_v60 = vshrl.u32 %v665_v35, %v83_v33  ;;  %vm102_vm4 = vcmp.lt.s32.totalorder %v81_v34, 3  ;;  %vm101_vm5 = vcmp.lt.s32.totalorder %v81_v34, 2 }
  0xab   :  { %v87_v52 = vor.u32 %v86_v39, %v85_v36  ;;  %v90_v53 = vor.u32 %v89_v41, %v88_v38  ;;  %v93_v54 = vor.u32 %v92_v44, %v91_v42  ;;  %v96_v55 = vor.u32 %v95_v47, %v94_v45 }
  0xac   :  { %v99_v56 = vor.u32 %v98_v50, %v97_v48  ;;  %v65_v46 = vlaneseq }
  0xad   :  { %v105_v57 = vsel %vm103_vm3, %v93_v54, 2102212464  ;;  %v108_v58 = vsel %vm100_vm2, %v87_v52, %v90_v53  ;;  %v112_v59 = vsel %vm100_vm2, %v90_v53, %v93_v54  ;;  %v109_v61 = vsel %vm103_vm3, %v96_v55, 920167782 }
  0xae   :  { %v113_v62 = vsel %vm103_vm3, %v99_v56, 1326507024  ;;  %v110_v63 = vsel %vm102_vm4, %v93_v54, %v109_v61  ;;  %v104_v3 = vsel %vm100_vm2, %v84_v60, %v87_v52  ;;  %v106_v4 = vsel %vm102_vm4, %v90_v53, %v105_v57 }
  0xaf   :  { %v114_v0 = vsel %vm102_vm4, %v96_v55, %v113_v62  ;;  %v111_v5 = vsel %vm101_vm5, %v108_v58, %v110_v63  ;;  %v107_v11 = vsel %vm101_vm5, %v104_v3, %v106_v4  ;;  %v66_v48 = vand.u32 127, %v65_v46  ;;  %v385_v3 = vld [vmem:[#allocation4 + $0x50] sm:$0xff]  ;;  %v383_v4 = vld [vmem:[#allocation4 + $0x40] sm:$0xff] }
  0xb0   :  { %v115_v6 = vsel %vm101_vm5, %v112_v59, %v114_v0  ;;  %v752_v9 = vmul.u32.u64.low %v116_v1, %v111_v5  ;;  %v753_v10 = vmul.u32.u64.high %v116_v1, %v111_v5, %v752_v9  ;;  %v123_v13 = vmul.u32 %v116_v1, %v107_v11  ;;  %v387_v0 = vld [vmem:[#allocation4 + $0x60] sm:$0xff]  ;;  %v381_v5 = vld [vmem:[#allocation4 + $0x30] sm:$0xff] }
  0xb1   :  { %v749_v7 = vmul.u32.u64.low %v116_v1, %v115_v6  ;;  %v750_v8 = vmul.u32.u64.high %v116_v1, %v115_v6, %v749_v7  ;;  %vm67_vm10 = vcmp.lt.s32.totalorder %v66_v48, 64  ;;  %562 = vmatpush3.msra.mxu1 %v387_v0  ;;  %v386_v1 = vld [vmem:[#allocation4 + $0x58] sm:$0xff]  ;;  %v380_v6 = vld [vmem:[#allocation4 + $0x28] sm:$0xff]  ;;  %v375_v11 = vld [vmem:[#allocation4] sm:$0xff] }
  0xb2   :  { %v126_v12 = vadd.s32 1, %v753_v10  ;;  %563 = vmatprep.subr.mxu1 %v663_v2  ;;  %v379_v7 = vld [vmem:[#allocation4 + $0x20] sm:$0xff] }
  0xb3   :  { %vm125_vm6 = vc.u32 %v750_v8, %v752_v9  ;;  %v124_v27 = vadd.s32 %v752_v9, %v750_v8  ;;  %564 = vmatpush3.msra.mxu1 %v386_v1  ;;  %v378_v8 = vld [vmem:[#allocation4 + $0x18] sm:$0xff]  ;;  %v377_v9 = vld [vmem:[#allocation4 + $0x10] sm:$0xff] }
  0xb4   :  { %v127_v14 = vsel %vm125_vm6, %v126_v12, %v753_v10  ;;  %565 = vmatprep.subr.mxu1 %v663_v2  ;;  %v376_v10 = vld [vmem:[#allocation4 + $0x8] sm:$0xff]  ;;  %v484_v12 = vld [vmem:[%s790_s3] ss:$0 sm:$0xff] }
  0xb5   :  { %v128_v15 = vadd.s32 %v127_v14, %v123_v13  ;;  %566 = vmatpush3.msra.mxu1 %v385_v3 }
  0xb6   :  { %567 = vmatprep.subr.mxu1 %v663_v2 }
  0xb7   :  { %v129_v16 = vadd.s32 536870912, %v128_v15 }
  0xb9   :  { %v130_v17 = vshrl.u32 %v129_v16, 30 }
  0xbb   :  { %v131_v18 = vshll.u32 %v130_v17, 30  ;;  %v154_v41 = vsub.s32 4, %v130_v17 }
  0xbd   :  { %v132_v19 = vsub.s32 %v128_v15, %v131_v18  ;;  %v155_v44 = vsel %vm70_vm8, %v154_v41, %v130_v17 }
  0xbe   :  { %v157_v45 = vsel %vm69_vm9, 0, %v155_v44 }
  0xbf   :  { %v134_v20 = vsub.s32 0, %v132_v19  ;;  %v161_v47 = vadd.s32 3, %v157_v45  ;;  %v265_v50 = vand.u32 3, %v157_v45 }
  0xc1   :  { %v477_v21 = vmin.u32 %v134_v20, %v132_v19  ;;  %v162_v49 = vand.u32 3, %v161_v47  ;;  %vm270_vm12 = vcmp.eq.s32.totalorder %v265_v50, 2  ;;  %vm267_vm14 = vcmp.eq.s32.totalorder %v265_v50, 0 }
  0xc2   :  { %vm266_vm0 = vcmp.lt.s32.totalorder %v265_v50, 2 }
  0xc3   :  { %v136_v22 = vclz %v477_v21  ;;  %vm167_vm11 = vcmp.eq.s32.totalorder %v162_v49, 2  ;;  %vm164_vm13 = vcmp.eq.s32.totalorder %v162_v49, 0  ;;  %vm163_vm15 = vcmp.lt.s32.totalorder %v162_v49, 2  ;;  %v485_v21 = vld [vmem:[%s792_s5] ss:$0 sm:$0xff] }
  0xc5   :  { %v478_v25 = vadd.s32 4294967294, %v136_v22 }
  0xc7   :  { %vm479_vm7 = vcmp.lt.s32.totalorder %v478_v25, 0 }
  0xc8   :  { %v139_v26 = vsel %vm479_vm7, 0, %v478_v25 }
  0xc9   :  { %v140_v28 = vsub.s32 32, %v139_v26  ;;  %v144_v30 = vsub.s32 4294967266, %v139_v26  ;;  %v141_v31 = vshll.u32 %v132_v19, %v139_v26 }
  0xcb   :  { %v142_v32 = vshrl.u32 %v124_v27, %v140_v28  ;;  %v145_v33 = vadd.s32 127, %v144_v30 }
  0xcd   :  { %v143_v34 = vor.u32 %v142_v32, %v141_v31  ;;  %v146_v35 = vshll.u32 %v145_v33, 23 }
  0xcf   :  { %v147_v36 = vor.u32 4788187, %v146_v35  ;;  %v150_v38 = vcvt.s32.f32 %v143_v34 }
  0xd1   :  { %v148_v37 = vand.u32 2147483647, %v147_v36 }
  0xd3   :  { %v151_v39 = vmul.f32 %v150_v38, %v148_v37 }
  0xd5   :  { %v152_v40 = vxor.u32 2147483648, %v151_v39 }
  0xd7   :  { %v153_v42 = vsel %vm70_vm8, %v152_v40, %v151_v39 }
  0xd8   :  { %v156_v43 = vsel %vm69_vm9, %v743_v24, %v153_v42  ;;  %v384_v24 = vld [vmem:[#allocation4 + $0x48] sm:$0xff] }
  0xd9   :  { %608 = vcosq.f32 %v156_v43  ;;  %568 = vmatpush3.msra.mxu1 %v384_v24 }
  0xda   :  { %610 = vsinq.f32 %v156_v43  ;;  %569 = vmatprep.subr.mxu1 %v663_v2 }
  0xdb   :  { %570 = vmatpush3.msra.mxu1 %v383_v4 }
  0xdc   :  { %571 = vmatprep.subr.mxu1 %v663_v2 }
  0xe6   :  { %v609_v51 = vpop.eup %608 }
  0xe7   :  { %v611_v52 = vpop.eup %610  ;;  %v168_v53 = vxor.u32 2147483648, %v609_v51 }
  0xe8   :  { %v165_v54 = vxor.u32 2147483648, %v611_v52 }
  0xe9   :  { %v169_v29 = vsel %vm167_vm11, %v168_v53, %v611_v52  ;;  %v272_v55 = vsel %vm270_vm12, %v168_v53, %v611_v52 }
  0xea   :  { %v166_v56 = vsel %vm164_vm13, %v609_v51, %v165_v54  ;;  %v269_v57 = vsel %vm267_vm14, %v609_v51, %v165_v54 }
  0xeb   :  { %v170_v58 = vsel %vm163_vm15, %v166_v56, %v169_v29  ;;  %v273_v59 = vsel %vm266_vm0, %v269_v57, %v272_v55 }
  0xec   :  { %v171_v60 = vsel %vm160_vm1, nan, %v170_v58  ;;  %v274_v61 = vsel %vm160_vm1, nan, %v273_v59 }
  0xed   :  { %v275_v62 = vsel %vm67_vm10, %v171_v60, %v274_v61 }
  0xee   :  { %v276_v63 = vadd.f32 %v275_v62, %v740_v23  ;;  %v382_v23 = vld [vmem:[#allocation4 + $0x38] sm:$0xff] }
  0xef   :  { %572 = vmatpush3.msra.mxu1 %v382_v23 }
  0xf0   :  { %553 = vmatmul.mubr.f32.vlgmr.msra.gmra.mxu0 %v276_v63  ;;  %573 = vmatprep.subr.mxu1 %v663_v2 }
  0xf1   :  { %574 = vmatpush3.msra.mxu1 %v381_v5 }
  0xf2   :  { %575 = vmatprep.subr.mxu1 %v663_v2 }
  0xf3   :  { %576 = vmatpush3.msra.mxu1 %v380_v6 }
  0xf4   :  { %577 = vmatprep.subr.mxu1 %v663_v2 }
  0xf5   :  { %578 = vmatpush3.msra.mxu1 %v379_v7 }
  0xf6   :  { %579 = vmatprep.subr.mxu1 %v663_v2 }
  0xf7   :  { %580 = vmatpush3.msra.mxu1 %v378_v8 }
  0xf8   :  { %581 = vmatprep.subr.mxu1 %v663_v2 }
  0xf9   :  { %582 = vmatpush3.msra.mxu1 %v377_v9 }
  0xfa   :  { %583 = vmatprep.subr.mxu1 %v663_v2 }
  0xfb   :  { %584 = vmatpush3.msra.mxu1 %v376_v10 }
  0xfc   :  { %585 = vmatprep.subr.mxu1 %v663_v2 }
  0xfd   :  { %586 = vmatpush3.msra.mxu1 %v375_v11 }
 0x1b0   :  { %v366_v13 = vpop.f32.mrf.mxu0 }
 0x1b1   :  { %v367_v14 = vadd.f32 %v484_v12, %v366_v13 }
 0x1b2   :  { %v554_v15 = vpop.f32.mrf.mxu0 }
 0x1b3   :  { %v370_v16 = vmul.f32 0.5, %v367_v14 }
 0x1b5   :  { %612 = vtanh.f32 %v370_v16 }
 0x1c2   :  { %v613_v17 = vpop.eup %612 }
 0x1c3   :  { %v372_v18 = vadd.f32 1.0, %v613_v17 }
 0x1c5   :  { %v373_v19 = vmul.f32 0.5, %v372_v18 }
 0x1c7   :  { %v374_v20 = vmul.f32 %v373_v19, %v367_v14 }
 0x1c9   :  { %588 = vmatmul.mubr.f32.vlgmr.msra.gmra.mxu1 %v374_v20 }
 0x289   :  { %v464_v2 = vpop.f32.mrf.mxu1 }
 0x28a   :  { %v465_v22 = vadd.f32 %v485_v21, %v464_v2 }
 0x28b   :  { %v589_v25 = vpop.f32.mrf.mxu1 }
 0x28c   :  { %468 = vst [vmem:[%s793_s6] sm:$0xff] %v465_v22 }
 0x28d   :  { %473 = vsyncpa [#allocation3], 1 }
 0x28e   :  { %474 = vsyncpa [#allocation5], 1 }

</bundles_post_ra>
